<compile_context>
chip_gen: v6e
topology: v6e:2x2x1
jax: 0.10.0
libtpu: 0.0.40
codegen_flags: <defaults>
</compile_context>

<pallas_src>
import functools

import jax
import jax.numpy as jnp
from jax.experimental import pallas as pl
from jax.experimental.pallas import tpu as pltpu

SUB = 8      # f32 sublanes per vreg
LANE = 128   # lanes per vreg


def _round_up(x, m):
    return ((x + m - 1) // m) * m


def planar_flow_kernel(z_ref, scal_ref, znew_ref, logdet_ref, *, dim):
    # scal layout (SMEM): [w_0..w_{D-1}, b, u.w, u_0..u_{D-1}]
    b = scal_ref[dim]
    udw = scal_ref[dim + 1]

    # Load the D feature planes once; each plane is a dense (TM, 128) slab.
    zs = [z_ref[d] for d in range(dim)]

    # z_dash = w . z + b : explicit scalar-FMA chain on the VPU (no XLU/MXU).
    z_dash = zs[0] * scal_ref[0] + b
    for d in range(1, dim):
        z_dash = z_dash + zs[d] * scal_ref[d]

    hz = jnp.tanh(z_dash)                       # (TM, 128), EUP

    # z_new[d] = z[d] + u_d * h(z_dash)  -- scalar-FMA per feature plane.
    for d in range(dim):
        znew_ref[d] = zs[d] + scal_ref[dim + 2 + d] * hz

    # log |det J| = log(|1 + (u.w) * (1 - h^2)| + tol) -- dense (TM,128) store.
    h_prime = 1.0 - hz * hz
    logdet_ref[...] = jnp.log(jnp.abs(1.0 + udw * h_prime) + 1e-6)


def planar_flow(z, w, u, b, *, tm=1024):
    """z: (N, D) f32; w, u: (1, D) f32; b: scalar f32. Returns (z_new, logdet)."""
    N, D = z.shape
    z = z.astype(jnp.float32)
    w = w.astype(jnp.float32)
    u = u.astype(jnp.float32)

    # --- invertibility reparameterization of u (scalar glue, plain JAX) ----
    # m(x) = -1 + log(1 + exp(x)) via stable softplus; safe norm so the
    # unselected branch never produces NaN.  (Matches torch module: /||w||.)
    u_dot_w = jnp.sum(u * w)
    m_val = -1.0 + jax.nn.softplus(u_dot_w)
    w_norm = jnp.maximum(jnp.linalg.norm(w), 1e-12)
    u_fixed = u + (m_val - u_dot_w) * w / w_norm
    u_eff = jnp.where(u_dot_w < -1.0, u_fixed, u)
    udw_eff = jnp.sum(u_eff * w)          # u.w used in the log-Jacobian

    # --- tile selection: batch -> (ROWS, 128) planes, ROWS tiled by TM -------
    rows = _round_up(pl.cdiv(N, LANE), SUB)          # 128-wide rows, 8-aligned
    tm = max(SUB, (int(tm) // SUB) * SUB)            # requested tile, 8-aligned
    tm = min(tm, rows)
    # Keep >= 2 grid steps when there is more than one tile of data so the
    # "parallel" axis can shard across v7x's two TensorCores.
    if rows > SUB and tm == rows:
        tm = max(SUB, (rows // 2 // SUB) * SUB)
    rows_pad = _round_up(rows, tm)                   # grid divides evenly
    n_pad = rows_pad * LANE
    grid = rows_pad // tm

    # --- dense layout: (N, D) -> (D, ROWS, 128); pad tail columns with 0 -----
    z_t = z.T                                        # (D, N)
    if n_pad != N:
        z_t = jnp.pad(z_t, ((0, 0), (0, n_pad - N)))
    z_p = z_t.reshape(D, rows_pad, LANE)

    # SMEM scalar vector: [w_0..w_{D-1}, b, u.w, u_0..u_{D-1}]
    scal = jnp.concatenate([
        w.reshape(D),
        jnp.asarray(b, jnp.float32).reshape(1),
        udw_eff.reshape(1),
        u_eff.reshape(D),
    ]).astype(jnp.float32)

    znew_p, logdet_p = pl.pallas_call(
        functools.partial(planar_flow_kernel, dim=D),
        out_shape=(
            jax.ShapeDtypeStruct((D, rows_pad, LANE), jnp.float32),
            jax.ShapeDtypeStruct((rows_pad, LANE), jnp.float32),
        ),
        grid_spec=pltpu.PrefetchScalarGridSpec(
            num_scalar_prefetch=0,
            grid=(grid,),
            in_specs=[
                pl.BlockSpec((D, tm, LANE), lambda i: (0, i, 0)),       # z tile
                pl.BlockSpec(memory_space=pltpu.MemorySpace.SMEM),      # scalars
            ],
            out_specs=[
                pl.BlockSpec((D, tm, LANE), lambda i: (0, i, 0)),       # z_new
                pl.BlockSpec((tm, LANE), lambda i: (i, 0)),             # logdet
            ],
        ),
        compiler_params=pltpu.CompilerParams(
            dimension_semantics=("parallel",),
            vmem_limit_bytes=32 * 1024 * 1024,
        ),
    )(z_p, scal)

    # Padded batch columns hold garbage; slice them off here.
    z_new = znew_p.reshape(D, n_pad)[:, :N].T        # (N, D)
    logdet = logdet_p.reshape(n_pad)[:N].reshape(N, 1)
    return z_new, logdet


def planar_flow_ref(z, w, u, b):
    """Pure-JAX reference mirroring the PyTorch module."""
    u_dot_w = jnp.sum(u * w)
    m_val = -1.0 + jnp.log1p(jnp.exp(u_dot_w))
    u_eff = jnp.where(u_dot_w < -1.0,
                      u + (m_val - u_dot_w) * w / jnp.linalg.norm(w), u)
    z_dash = z @ w.T + b
    hz = jnp.tanh(z_dash)
    z_new = z + u_eff * hz
    det = jnp.abs(1.0 + jnp.sum(u_eff * w) * (1.0 - hz ** 2))
    return z_new, jnp.log(det + 1e-6)


if __name__ == "__main__":
    key = jax.random.PRNGKey(0)
    k_z, k_w, k_u, k_b = jax.random.split(key, 4)

    N, D = 8, 2                                    # module default dim=2
    z = jax.random.normal(k_z, (N, D), jnp.float32)
    w = 0.1 * jax.random.normal(k_w, (1, D), jnp.float32)
    u = 0.1 * jax.random.normal(k_u, (1, D), jnp.float32)
    b = 0.1 * jax.random.normal(k_b, (), jnp.float32)

    planar_jit = jax.jit(functools.partial(planar_flow, tm=1024))

    z_new, logdet = planar_jit(z, w, u, b)
    jax.block_until_ready((z_new, logdet))
    z_new_ref, logdet_ref = planar_flow_ref(z, w, u, b)
    assert z_new.shape == (N, D) and logdet.shape == (N, 1)
    assert jnp.allclose(z_new, z_new_ref, atol=1e-5), "z_new mismatch"
    assert jnp.allclose(logdet, logdet_ref, atol=1e-5), "logdet mismatch"

    # Ragged batch (not a multiple of 128): exercises padding + dense planes.
    N2 = 300
    z2 = jax.random.normal(k_z, (N2, D), jnp.float32)
    z_new2, logdet2 = planar_jit(z2, w, u, b)
    jax.block_until_ready((z_new2, logdet2))
    z_new2_ref, logdet2_ref = planar_flow_ref(z2, w, u, b)
    assert z_new2.shape == (N2, D) and logdet2.shape == (N2, 1)
    assert jnp.allclose(z_new2, z_new2_ref, atol=1e-5), "z_new mismatch (ragged)"
    assert jnp.allclose(logdet2, logdet2_ref, atol=1e-5), "logdet mismatch (ragged)"

    print("KERNEL_OK")
</pallas_src>

<mosaic_0001>
module attributes {stable_mosaic.version = 11 : i64} {
  func.func @planar_flow_kernel(%arg0: i32, %arg1: memref<2x8x128xf32, #tpu.memory_space<vmem>>, %arg2: memref<6xf32, #tpu.memory_space<smem>>, %arg3: memref<2x8x128xf32, #tpu.memory_space<vmem>>, %arg4: memref<8x128xf32, #tpu.memory_space<vmem>>) attributes {dimension_semantics = [#tpu.dimension_semantics<parallel>], iteration_bounds = array<i64: 1>, scalar_prefetch = 0 : i64, scratch_operands = 0 : i64, tpu.core_type = #tpu.core_type<tc>, window_params = [{transform_indices = @transform_0, window_bounds = array<i64: 2, 8, 128>}, {transform_indices = @transform_1, window_bounds = array<i64: 6>}, {transform_indices = @transform_2, window_bounds = array<i64: 2, 8, 128>}, {transform_indices = @transform_3, window_bounds = array<i64: 8, 128>}]} {
    %c2 = arith.constant 2 : index
    %0 = memref.load %arg2[%c2] : memref<6xf32, #tpu.memory_space<smem>>
    %c3 = arith.constant 3 : index
    %1 = memref.load %arg2[%c3] : memref<6xf32, #tpu.memory_space<smem>>
    %c0 = arith.constant 0 : index
    %c0_0 = arith.constant 0 : index
    %c0_1 = arith.constant 0 : index
    %2 = vector.load %arg1[%c0, %c0_0, %c0_1] : memref<2x8x128xf32, #tpu.memory_space<vmem>>, vector<1x8x128xf32>
    %3 = vector.shape_cast %2 : vector<1x8x128xf32> to vector<8x128xf32>
    %c1 = arith.constant 1 : index
    %c0_2 = arith.constant 0 : index
    %c0_3 = arith.constant 0 : index
    %4 = vector.load %arg1[%c1, %c0_2, %c0_3] : memref<2x8x128xf32, #tpu.memory_space<vmem>>, vector<1x8x128xf32>
    %5 = vector.shape_cast %4 : vector<1x8x128xf32> to vector<8x128xf32>
    %c0_4 = arith.constant 0 : index
    %6 = memref.load %arg2[%c0_4] : memref<6xf32, #tpu.memory_space<smem>>
    %7 = vector.broadcast %6 : f32 to vector<8x128xf32>
    %8 = arith.mulf %3, %7 : vector<8x128xf32>
    %9 = vector.broadcast %0 : f32 to vector<8x128xf32>
    %10 = arith.addf %8, %9 : vector<8x128xf32>
    %c1_5 = arith.constant 1 : index
    %11 = memref.load %arg2[%c1_5] : memref<6xf32, #tpu.memory_space<smem>>
    %12 = vector.broadcast %11 : f32 to vector<8x128xf32>
    %13 = arith.mulf %5, %12 : vector<8x128xf32>
    %14 = arith.addf %10, %13 : vector<8x128xf32>
    %15 = math.tanh %14 : vector<8x128xf32>
    %c4 = arith.constant 4 : index
    %16 = memref.load %arg2[%c4] : memref<6xf32, #tpu.memory_space<smem>>
    %17 = vector.broadcast %16 : f32 to vector<8x128xf32>
    %18 = arith.mulf %17, %15 : vector<8x128xf32>
    %19 = arith.addf %3, %18 : vector<8x128xf32>
    %c0_6 = arith.constant 0 : index
    %c0_7 = arith.constant 0 : index
    %c0_8 = arith.constant 0 : index
    %20 = vector.load %arg3[%c0_6, %c0_7, %c0_8] : memref<2x8x128xf32, #tpu.memory_space<vmem>>, vector<1x8x128xf32>
    %21 = vector.shape_cast %20 : vector<1x8x128xf32> to vector<8x128xf32>
    %22 = vector.shape_cast %19 : vector<8x128xf32> to vector<1x8x128xf32>
    tpu.vector_store %arg3[%c0_6, %c0_7, %c0_8], %22 {strides = array<i32>} : memref<2x8x128xf32, #tpu.memory_space<vmem>>, vector<1x8x128xf32>,
    %c5 = arith.constant 5 : index
    %23 = memref.load %arg2[%c5] : memref<6xf32, #tpu.memory_space<smem>>
    %24 = vector.broadcast %23 : f32 to vector<8x128xf32>
    %25 = arith.mulf %24, %15 : vector<8x128xf32>
    %26 = arith.addf %5, %25 : vector<8x128xf32>
    %c1_9 = arith.constant 1 : index
    %c0_10 = arith.constant 0 : index
    %c0_11 = arith.constant 0 : index
    %27 = vector.load %arg3[%c1_9, %c0_10, %c0_11] : memref<2x8x128xf32, #tpu.memory_space<vmem>>, vector<1x8x128xf32>
    %28 = vector.shape_cast %27 : vector<1x8x128xf32> to vector<8x128xf32>
    %29 = vector.shape_cast %26 : vector<8x128xf32> to vector<1x8x128xf32>
    tpu.vector_store %arg3[%c1_9, %c0_10, %c0_11], %29 {strides = array<i32>} : memref<2x8x128xf32, #tpu.memory_space<vmem>>, vector<1x8x128xf32>,
    %30 = arith.mulf %15, %15 : vector<8x128xf32>
    %cst = arith.constant 1.000000e+00 : f32
    %31 = vector.broadcast %cst : f32 to vector<8x128xf32>
    %32 = arith.subf %31, %30 : vector<8x128xf32>
    %33 = vector.broadcast %1 : f32 to vector<8x128xf32>
    %34 = arith.mulf %33, %32 : vector<8x128xf32>
    %cst_12 = arith.constant 1.000000e+00 : f32
    %35 = vector.broadcast %cst_12 : f32 to vector<8x128xf32>
    %36 = arith.addf %35, %34 : vector<8x128xf32>
    %37 = math.absf %36 : vector<8x128xf32>
    %cst_13 = arith.constant 9.99999997E-7 : f32
    %38 = vector.broadcast %cst_13 : f32 to vector<8x128xf32>
    %39 = arith.addf %37, %38 : vector<8x128xf32>
    %40 = math.log %39 : vector<8x128xf32>
    %c0_14 = arith.constant 0 : index
    %c0_15 = arith.constant 0 : index
    %41 = vector.load %arg4[%c0_14, %c0_15] : memref<8x128xf32, #tpu.memory_space<vmem>>, vector<8x128xf32>
    tpu.vector_store %arg4[%c0_14, %c0_15], %40 {strides = array<i32>} : memref<8x128xf32, #tpu.memory_space<vmem>>, vector<8x128xf32>,
    return
  }
  func.func @transform_0(%arg0: i32) -> (i32, i32, i32) {
    %c0_i32 = arith.constant 0 : i32
    %c0_i32_0 = arith.constant 0 : i32
    %c0_i32_1 = arith.constant 0 : i32
    return %c0_i32, %arg0, %c0_i32_0 : i32, i32, i32
  }
  func.func @transform_1(%arg0: i32) -> i32 {
    %c0_i32 = arith.constant 0 : i32
    %c0_i32_0 = arith.constant 0 : i32
    return %c0_i32 : i32
  }
  func.func @transform_2(%arg0: i32) -> (i32, i32, i32) {
    %c0_i32 = arith.constant 0 : i32
    %c0_i32_0 = arith.constant 0 : i32
    %c0_i32_1 = arith.constant 0 : i32
    return %c0_i32, %arg0, %c0_i32_0 : i32, i32, i32
  }
  func.func @transform_3(%arg0: i32) -> (i32, i32) {
    %c0_i32 = arith.constant 0 : i32
    %c0_i32_0 = arith.constant 0 : i32
    return %arg0, %c0_i32 : i32, i32
  }
}

</mosaic_0001>

<bundles_post_ra>
// kernel: planar_flow.1
= control target key start
LH: loop header
LB: loop body
LE: loop exit
PB: predicated region body
PF: predicated region fallthrough
CT: control target
= control target key end

     0   :  { %9 = vsyncpa [#allocation3], 0  ;;  %s136_s0 = inlined_call_operand.vmem [shape: f32[2,8,128], index: 0, kind: input, shape index: {}]   ;;  %s137_s1 = inlined_call_operand.vmem [shape: f32[6], index: 1, kind: input, shape index: {}]   ;;  %s138_s2 = inlined_call_operand.vmem [shape: f32[2,8,128], index: 2, kind: output, shape index: {0}]   ;;  %s139_s3 = inlined_call_operand.vmem [shape: f32[8,128], index: 3, kind: output, shape index: {1}]  }
   0x1   :  { %s18_s14 = sshll.u32 %s137_s1, 4  ;;  %s19_s14 = int_to_ptr.vmem [resolvable:$true] %s18_s14 }
   0x2   :  { %s83_s15 = scalar_lea.vmem %s19_s14, 16  ;;  %p88_p1 = scmp.lt.s32.totalorder %s19_s14, %s19_s14 }
   0x3   :  { %p84_p0 = scmp.ne.s32.totalorder %s19_s14, %s83_s15  ;;  %p89_p2 = scmp.lt.s32.totalorder %s83_s15, %s83_s15 }
   0x5   :  { %p90_p3 = por %p89_p2, %p88_p1 }
   0x7   :  { %p91_p4 = pnand %p90_p3, %p84_p0 }
   0x9   :  { %94 = shalt.err (!%p91_p4)
}
   0xa   :  { %s97_s16 = smov [#allocation2]  }
   0xb   :  { %21 = dma.vmem_to_smem %s19_s14, 16, %s97_s16, [#allocation3]  }
   0xc   :  { %95 = dma.done.wait [#allocation3], 16  }
   0xd   :  { %96 = vsyncadd [#allocation3], 4294967280 }
   0xe   :  { %25 = sfence }
   0xf   :  { %s71_s17 = sld [smem:[#allocation2 + $0x2]]  ;;  %v28_v0 = vld [vmem:[%s136_s0] sm:$0xff]  ;;  %v73_v1 = vld [vmem:[%s136_s0 + $0x8] sm:$0xff] }
  0x10   :  { %s31_s18 = sld [smem:[#allocation2]] }
  0x11   :  { %s74_s19 = sld [smem:[#allocation2 + $0x1]] }
  0x12   :  { %s75_s23 = sld [smem:[#allocation2 + $0x4]] }
  0x13   :  { %s76_s24 = sld [smem:[#allocation2 + $0x5]] }
  0x14   :  { %s72_s25 = sld [smem:[#allocation2 + $0x3]] }
  0x15   :  { %v34_v3 = vstv %s71_s17 }
  0x16   :  { %v32_v2 = vstv %s31_s18 }
  0x17   :  { %v33_v4 = vmul.f32 %v32_v2, %v28_v0  ;;  %v37_v5 = vstv %s74_s19 }
  0x18   :  { %v38_v6 = vmul.f32 %v73_v1, %v37_v5  ;;  %v42_v9 = vstv %s75_s23 }
  0x19   :  { %v35_v7 = vadd.f32 %v34_v3, %v33_v4  ;;  %v47_v10 = vstv %s76_s24 }
  0x1a   :  { %v54_v15 = vstv %s72_s25 }
  0x1b   :  { %v39_v8 = vadd.f32 %v38_v6, %v35_v7 }
  0x1d   :  { %79 = vtanh.f32 %v39_v8 }
  0x2a   :  { %v80_v11 = vpop.eup %79 }
  0x2b   :  { %v43_v12 = vmul.f32 %v80_v11, %v42_v9  ;;  %v48_v13 = vmul.f32 %v80_v11, %v47_v10  ;;  %v52_v14 = vmul.f32 %v80_v11, %v80_v11 }
  0x2d   :  { %v44_v16 = vadd.f32 %v43_v12, %v28_v0  ;;  %v49_v17 = vadd.f32 %v73_v1, %v48_v13  ;;  %v53_v18 = vsub.f32 1.0, %v52_v14 }
  0x2f   :  { %45 = vst [vmem:[%s138_s2] sm:$0xff] %v44_v16  ;;  %77 = vst [vmem:[%s138_s2 + $0x8] sm:$0xff] %v49_v17  ;;  %v55_v19 = vmul.f32 %v54_v15, %v53_v18 }
  0x31   :  { %v56_v20 = vadd.f32 1.0, %v55_v19 }
  0x33   :  { %v57_v21 = vand.u32 2147483647, %v56_v20 }
  0x35   :  { %v58_v22 = vadd.f32 1e-06, %v57_v21 }
  0x37   :  { %81 = vlog2.f32 %v58_v22 }
  0x44   :  { %v82_v23 = vpop.eup %81 }
  0x45   :  { %v60_v24 = vmul.f32 0.6931472, %v82_v23 }
  0x47   :  { %61 = vst [vmem:[%s139_s3] sm:$0xff] %v60_v24 }
  0x48   :  { %70 = vsyncpa [#allocation3], 1 }

</bundles_post_ra>
